<compile_context>
chip_gen: v7x
topology: tpu7x:2x2x1
jax: 0.10.0
libtpu: 0.0.40
codegen_flags: <defaults>
</compile_context>

<pallas_src>
import jax
import jax.numpy as jnp
from jax.experimental import pallas as pl
from jax.experimental.pallas import tpu as pltpu


def _round_up(x, m):
    return (x + m - 1) // m * m


def _bias_add_kernel(x_ref, b_ref, o_ref):
    # x_ref: (TR, TH) tile, b_ref: (1, TH) bias tile broadcast over sublanes.
    o_ref[...] = x_ref[...] + b_ref[...]


def _per_buffer_bytes():
    # v7x: bigger row tiles (HBM twice as fast -> per-step overhead twice as
    # visible); v5e/v6e: 2 MiB already sits at ~85% of roofline (measured).
    try:
        kind = jax.devices()[0].device_kind.lower()
    except Exception:  # pragma: no cover - non-TPU / query failure
        kind = ""
    return 4 * 1024 * 1024 if "v7" in kind else 2 * 1024 * 1024


def learnable_bias_forward(x, bias):
    """out = x + bias, bias shape (out_chn,), broadcast over all leading dims."""
    orig_shape = x.shape
    hidden = orig_shape[-1]
    assert bias.shape == (hidden,), "bias must match last dim of x"

    dtype = x.dtype
    itemsize = jnp.dtype(dtype).itemsize
    # Sublane packing: 8 rows/vreg for 4-byte, 16 for bf16, 32 for 1-byte.
    row_align = max(8, 32 // itemsize)

    x2d = x.reshape(-1, hidden)   # row-major reshape: no copy
    rows = x2d.shape[0]
    b2d = bias.reshape(1, hidden)  # only "2-D-ification"; never physically padded

    elem_budget = _per_buffer_bytes() // itemsize

    # ---- Lane (hidden) tiling ----
    # Full hidden width whenever even a minimal (row_align, hidden) slab fits
    # the budget; else fixed 2048-lane tiles with a ragged cdiv edge.
    full_width = row_align * hidden <= elem_budget
    th = hidden if full_width else 2048

    # ---- Row tiling ----
    tr = max(row_align, (elem_budget // th) // row_align * row_align)
    if rows > 2 * row_align:
        # Keep >=2 row blocks so a "parallel" axis has work to shard across
        # v7x's two TensorCores (negligible cost on v5e/v6e).
        tr = min(tr, _round_up(pl.cdiv(rows, 2), row_align))
    if tr >= rows:
        # Single full-dim row block (exempt from the 8-sublane alignment rule).
        tr = rows

    n_r = pl.cdiv(rows, tr)
    n_h = pl.cdiv(hidden, th)

    # Pipeline VMEM: x + out double-buffered, plus the small bias block. Only
    # raise the scoped limit when we actually exceed v5e's 16 MiB default.
    est_vmem = 2 * 2 * tr * th * itemsize + 2 * th * itemsize
    vmem_limit = 32 * 1024 * 1024 if est_vmem > 14 * 1024 * 1024 else None

    cost = pl.CostEstimate(
        flops=rows * hidden,
        transcendentals=0,
        bytes_accessed=2 * rows * hidden * itemsize + hidden * itemsize,
    )

    if n_h == 1:
        # 1-D grid over rows, full hidden width per tile, bias resident.
        grid = (n_r,)
        in_specs = [
            pl.BlockSpec((tr, th), lambda i: (i, 0)),   # x tile
            pl.BlockSpec((1, th), lambda i: (0, 0)),    # bias: constant block
        ]
        out_spec = pl.BlockSpec((tr, th), lambda i: (i, 0))
        semantics = ("parallel",)
    else:
        # 2-D grid: hidden OUTER, rows INNER, so the bias block index is
        # constant across the inner axis and stays resident (no per-step DMA).
        grid = (n_h, n_r)
        in_specs = [
            pl.BlockSpec((tr, th), lambda j, i: (i, j)),  # x tile
            pl.BlockSpec((1, th), lambda j, i: (0, j)),   # bias lane tile
        ]
        out_spec = pl.BlockSpec((tr, th), lambda j, i: (i, j))
        semantics = ("parallel", "parallel")

    out2d = pl.pallas_call(
        _bias_add_kernel,
        out_shape=jax.ShapeDtypeStruct((rows, hidden), dtype),
        grid_spec=pltpu.PrefetchScalarGridSpec(
            num_scalar_prefetch=0,
            grid=grid,
            in_specs=in_specs,
            out_specs=out_spec,
        ),
        compiler_params=pltpu.CompilerParams(
            dimension_semantics=semantics,
            vmem_limit_bytes=vmem_limit,
        ),
        cost_estimate=cost,
    )(x2d, b2d)

    return out2d.reshape(orig_shape)


if __name__ == "__main__":
    # Module __init__: bias = zeros(out_chn). Use deterministic nonzero bias so
    # the broadcast-add is observable (synthetic params, no checkpoint).
    key = jax.random.PRNGKey(0)
    kx1, kb1, kx2, kb2, kx3, kb3 = jax.random.split(key, 6)

    # Case 1: f32, aligned hidden (128) and rows.
    x1 = jax.random.normal(kx1, (2, 8, 128), dtype=jnp.float32)
    bias1 = jax.random.normal(kb1, (128,), dtype=jnp.float32)
    out1 = jax.block_until_ready(learnable_bias_forward(x1, bias1))
    ref1 = x1 + bias1[None, None, :]
    assert out1.shape == x1.shape and out1.dtype == x1.dtype
    assert jnp.allclose(out1, ref1, atol=1e-6, rtol=1e-6)

    # Case 2: bf16, ragged rows (15) and non-128-multiple hidden (96):
    # exercises full-dim blocks with no physical padding anywhere.
    x2 = jax.random.normal(kx2, (3, 5, 96), dtype=jnp.float32).astype(jnp.bfloat16)
    bias2 = jax.random.normal(kb2, (96,), dtype=jnp.float32).astype(jnp.bfloat16)
    out2 = jax.block_until_ready(learnable_bias_forward(x2, bias2))
    ref2 = x2 + bias2[None, None, :]
    assert out2.shape == x2.shape and out2.dtype == x2.dtype
    assert jnp.allclose(out2.astype(jnp.float32), ref2.astype(jnp.float32),
                        atol=1e-2, rtol=1e-2)

    # Case 3: f32, rows not divisible by the row tile (28 rows -> 2 blocks with
    # a partial edge block): exercises the cdiv grid / masked edge path.
    x3 = jax.random.normal(kx3, (4, 7, 384), dtype=jnp.float32)
    bias3 = jax.random.normal(kb3, (384,), dtype=jnp.float32)
    out3 = jax.block_until_ready(learnable_bias_forward(x3, bias3))
    ref3 = x3 + bias3[None, None, :]
    assert out3.shape == x3.shape and out3.dtype == x3.dtype
    assert jnp.allclose(out3, ref3, atol=1e-6, rtol=1e-6)

    print("KERNEL_OK")
</pallas_src>

<mosaic_0001>
module attributes {stable_mosaic.version = 11 : i64} {
  func.func @_bias_add_kernel(%arg0: i32, %arg1: memref<16x128xf32, #tpu.memory_space<vmem>>, %arg2: memref<1x128xf32, #tpu.memory_space<vmem>>, %arg3: memref<16x128xf32, #tpu.memory_space<vmem>>) attributes {dimension_semantics = [#tpu.dimension_semantics<parallel>], iteration_bounds = array<i64: 1>, scalar_prefetch = 0 : i64, scratch_operands = 0 : i64, tpu.core_type = #tpu.core_type<tc>, window_params = [{transform_indices = @transform_0, window_bounds = array<i64: 16, 128>}, {pipeline_mode = #tpu.pipeline_mode<synchronous>, transform_indices = @transform_1, window_bounds = array<i64: 1, 128>}, {transform_indices = @transform_2, window_bounds = array<i64: 16, 128>}]} {
    %c0 = arith.constant 0 : index
    %c0_0 = arith.constant 0 : index
    %0 = vector.load %arg1[%c0, %c0_0] : memref<16x128xf32, #tpu.memory_space<vmem>>, vector<16x128xf32>
    %c0_1 = arith.constant 0 : index
    %c0_2 = arith.constant 0 : index
    %1 = vector.load %arg2[%c0_1, %c0_2] : memref<1x128xf32, #tpu.memory_space<vmem>>, vector<1x128xf32>
    %2 = vector.broadcast %1 : vector<1x128xf32> to vector<16x128xf32>
    %3 = arith.addf %0, %2 : vector<16x128xf32>
    %c0_3 = arith.constant 0 : index
    %c0_4 = arith.constant 0 : index
    %4 = vector.load %arg3[%c0_3, %c0_4] : memref<16x128xf32, #tpu.memory_space<vmem>>, vector<16x128xf32>
    tpu.vector_store %arg3[%c0_3, %c0_4], %3 {strides = array<i32>} : memref<16x128xf32, #tpu.memory_space<vmem>>, vector<16x128xf32>,
    return
  }
  func.func @transform_0(%arg0: i32) -> (i32, i32) {
    %c0_i32 = arith.constant 0 : i32
    %c0_i32_0 = arith.constant 0 : i32
    return %arg0, %c0_i32 : i32, i32
  }
  func.func @transform_1(%arg0: i32) -> (i32, i32) {
    %c0_i32 = arith.constant 0 : i32
    %c0_i32_0 = arith.constant 0 : i32
    %c0_i32_1 = arith.constant 0 : i32
    return %c0_i32, %c0_i32_0 : i32, i32
  }
  func.func @transform_2(%arg0: i32) -> (i32, i32) {
    %c0_i32 = arith.constant 0 : i32
    %c0_i32_0 = arith.constant 0 : i32
    return %arg0, %c0_i32 : i32, i32
  }
}

</mosaic_0001>

<bundles_post_ra>
// kernel: tpu_custom_call.1
= control target key start
LH: loop header
LB: loop body
LE: loop exit
PB: predicated region body
PF: predicated region fallthrough
CT: control target
= control target key end

     0   :  { %7 = vsyncpa [#allocation3], 0  ;;  %s161_s0 = inlined_call_operand.hbm [shape: f32[16,128], index: 0, kind: input, shape index: {}]   ;;  %s162_s1 = inlined_call_operand.vmem [shape: f32[1,128], index: 1, kind: input, shape index: {}]   ;;  %s163_s2 = inlined_call_operand.hbm [shape: f32[16,128], index: 2, kind: output, shape index: {}]  }
   0x1   :  { %8 = vsyncpa [#allocation4], 0  ;;  %s109_s9 = smov [#allocation2]   ;;  %s61_s13 = scalar_lea.hbm %s161_s0, 256 }
   0x2   :  { %s14_s10 = sshll.u32 %s109_s9, 4  ;;  %p62_p0 = scmp.ne.s32.totalorder %s161_s0, %s61_s13  ;;  %s15_s10 = int_to_ptr.vmem [resolvable:$true] %s14_s10 }
   0x3   :  { %p65_p1 = scmp.lt.u32.totalorder %s61_s13, %s161_s0 }
   0x5   :  { %p67_p2 = pnand %p65_p1, %p62_p0 }
   0x7   :  { %70 = shalt.err (!%p67_p2)
}
   0x8   :  { %s71_s18 = scalar_lea.vmem %s15_s10, 256  ;;  %p76_p4 = scmp.lt.s32.totalorder %s15_s10, %s15_s10 }
   0x9   :  { %p72_p3 = scmp.ne.s32.totalorder %s15_s10, %s71_s18  ;;  %p77_p5 = scmp.lt.s32.totalorder %s71_s18, %s71_s18 }
   0xb   :  { %p78_p6 = por %p77_p5, %p76_p4 }
   0xd   :  { %p79_p7 = pnand %p78_p6, %p72_p3 }
   0xf   :  { %82 = shalt.err (!%p79_p7)
}
  0x10   :  { %s110_s19 = smov 128   ;;  %s111_s20 = smov 8  }
  0x11   :  { %20 = dma.hbm_to_vmem [thread:$0]  %s161_s0, 256, %s15_s10, [#allocation3], %s110_s19, %s110_s19, %s111_s20  }
  0x12   :  { %105 = dma.done.wait [#allocation3], 256  }
  0x13   :  { %106 = vsyncadd [#allocation3], 4294967040  ;;  %s112_s23 = smov [#allocation5]   ;;  %v26_v0 = vld [vmem:[#allocation2] sm:$0xff]  ;;  %v27_v2 = vld [vmem:[#allocation2 + $0x8] sm:$0xff] }
  0x14   :  { %s44_s24 = sshll.u32 %s112_s23, 4  ;;  %v56_v1 = vld [vmem:[%s162_s1] ss:$0 sm:$0xff]  ;;  %s45_s24 = int_to_ptr.vmem [resolvable:$true] %s44_s24 }
  0x15   :  { %v35_v3 = vadd.f32 %v56_v1, %v26_v0  ;;  %v36_v4 = vadd.f32 %v56_v1, %v27_v2  ;;  %s83_s27 = scalar_lea.vmem %s45_s24, 256  ;;  %p88_p9 = scmp.lt.s32.totalorder %s45_s24, %s45_s24 }
  0x16   :  { %p84_p8 = scmp.ne.s32.totalorder %s45_s24, %s83_s27  ;;  %p89_p10 = scmp.lt.s32.totalorder %s83_s27, %s83_s27 }
  0x17   :  { %37 = vst [vmem:[#allocation5] sm:$0xff] %v35_v3  ;;  %38 = vst [vmem:[#allocation5 + $0x8] sm:$0xff] %v36_v4 }
  0x18   :  { %p90_p11 = por %p89_p10, %p88_p9 }
  0x1a   :  { %p91_p12 = pnand %p90_p11, %p84_p8 }
  0x1c   :  { %94 = shalt.err (!%p91_p12)
}
  0x1d   :  { %s95_s29 = scalar_lea.hbm %s163_s2, 256 }
  0x1e   :  { %p96_p13 = scmp.ne.s32.totalorder %s163_s2, %s95_s29  ;;  %p99_p0 = scmp.lt.u32.totalorder %s95_s29, %s163_s2 }
  0x20   :  { %p101_p1 = pnand %p99_p0, %p96_p13 }
  0x22   :  { %104 = shalt.err (!%p101_p1)
}
  0x23   :  { %50 = dma.vmem_to_hbm [thread:$0]  %s45_s24, 256, %s163_s2, [#allocation4], %s110_s19, %s110_s19, %s111_s20  }
  0x24   :  { %107 = dma.done.wait [#allocation4], 256  }
  0x25   :  { %108 = vsyncadd [#allocation4], 4294967040 }
  0x26   :  { %54 = vsyncpa [#allocation3], 1 }
  0x27   :  { %55 = vsyncpa [#allocation4], 1 }

</bundles_post_ra>
